<compile_context>
chip_gen: v7x
topology: tpu7x:2x2x1
jax: 0.10.0
libtpu: 0.0.40
codegen_flags: <defaults>
</compile_context>

<pallas_src>
import functools

import jax
import jax.numpy as jnp
from jax import lax
from jax.experimental import pallas as pl
from jax.experimental.pallas import tpu as pltpu

EPS = 1e-5  # PyTorch BatchNorm2d default


def basic_block_kernel(x_ref, w1_ref, w2_ref, g1_ref, b1_ref, g2_ref, b2_ref,
                       out_ref, *, H, W, C):
    X = x_ref[...]                     # (N*H, W*C) lane-dense f32 activations
    NH, WC = X.shape
    P = NH * W                         # N*H*W positions per channel
    inv_p = 1.0 / P

    # ---- hoisted constants (masks + channel fold/spread selectors) --------
    row = lax.broadcasted_iota(jnp.int32, (NH, WC), 0)
    h = row % H
    not_top = h != 0                   # row above exists within the same image
    not_bot = h != (H - 1)             # row below exists within the same image

    # lane j of the fused (W*C) axis holds channel (j % C)
    fold = (lax.broadcasted_iota(jnp.int32, (WC, C), 0) % C ==
            lax.broadcasted_iota(jnp.int32, (WC, C), 1)).astype(jnp.float32)
    spread = (lax.broadcasted_iota(jnp.int32, (C, WC), 1) % C ==
              lax.broadcasted_iota(jnp.int32, (C, WC), 0)).astype(jnp.float32)

    def conv3x3(Z, w_ref):
        # dy taps via sublane rotation (XLU slot) + boundary masks; the dx taps
        # and W zero-padding live inside the banded weights.  The 3 taps are
        # stacked along the lane axis and contracted in ONE K=3*W*Cin matmul
        # with bf16 operands / f32 accumulation.
        up = jnp.where(not_top, pltpu.roll(Z, 1, axis=0), 0.0)        # row h-1
        dn = jnp.where(not_bot, pltpu.roll(Z, NH - 1, axis=0), 0.0)   # row h+1
        lhs = jnp.concatenate([up, Z, dn], axis=1).astype(jnp.bfloat16)
        return jnp.dot(lhs, w_ref[...],
                       preferred_element_type=jnp.float32)            # (NH, W*Cout)

    def batchnorm(Y, g_ref, b_ref):
        # PyTorch training-mode BN, one-pass biased batch stats (f32).
        sums = jnp.concatenate(
            [jnp.sum(Y, axis=0, keepdims=True),
             jnp.sum(Y * Y, axis=0, keepdims=True)], axis=0)          # (2, WC)
        stats = jnp.dot(sums, fold,
                        preferred_element_type=jnp.float32) * inv_p   # (2, C)
        mean = stats[0:1]
        var = stats[1:2] - mean * mean
        s = lax.rsqrt(var + EPS) * g_ref[...]                         # (1, C)
        t = b_ref[...] - mean * s                                     # (1, C)
        st = jnp.dot(jnp.concatenate([s, t], axis=0), spread,
                     preferred_element_type=jnp.float32)              # (2, WC)
        return Y * st[0:1] + st[1:2]

    # conv1 -> bn1 -> relu -> conv2 -> bn2 -> (+identity) -> relu
    y = jnp.maximum(batchnorm(conv3x3(X, w1_ref), g1_ref, b1_ref), 0.0)
    y = batchnorm(conv3x3(y, w2_ref), g2_ref, b2_ref)
    out_ref[...] = jnp.maximum(y + X, 0.0)        # identity residual (no downsample)


def banded_conv_weights(wt, W, dtype=jnp.bfloat16):
    """HWIO (3,3,Cin,Cout) -> stacked banded matrix (3*W*Cin, W*Cout), bf16.

    For the dy band:  out[:, w*Cout+co] = sum_{dx,ci} in[:, (w+dx-1)*Cin+ci]
                                          * wt[dy, dx, ci, co]
    The W-boundary zero padding falls out of the band truncation; the three dy
    bands are stacked along K so the kernel does a single matmul per conv.
    """
    _, _, Cin, Cout = wt.shape
    eye = jnp.eye(W, dtype=jnp.float32)
    mats = []
    for dy in range(3):
        acc = jnp.zeros((W * Cin, W * Cout), jnp.float32)
        for dx in range(3):
            blk = jnp.kron(eye, wt[dy, dx].astype(jnp.float32))   # block-diag
            off = (dx - 1) * Cin
            if off > 0:
                blk = jnp.pad(blk, ((off, 0), (0, 0)))[:W * Cin]
            elif off < 0:
                blk = jnp.pad(blk, ((0, -off), (0, 0)))[-off:]
            acc = acc + blk
        mats.append(acc)
    return jnp.concatenate(mats, axis=0).astype(dtype)            # (3*W*Cin, W*Cout)


def basic_block_forward(x_nchw, w1, g1, b1, w2, g2, b2):
    """x_nchw: (N, C, H, W) float32, conv weights in HWIO. Returns NCHW."""
    N, C, H, W = x_nchw.shape
    Cout = w1.shape[-1]
    assert w1.shape == (3, 3, C, Cout) and w2.shape == (3, 3, Cout, Cout)
    # stride=1, downsample=None -> identity residual needs inplanes == planes.
    assert C == Cout, "identity residual requires inplanes == planes"

    # layout plumbing only: NCHW -> lane-dense (N*H, W*C)
    x = jnp.transpose(x_nchw, (0, 2, 3, 1)).astype(jnp.float32)
    x = x.reshape(N * H, W * C)

    B1 = banded_conv_weights(w1, W)     # (3*W*C, W*Cout) bf16
    B2 = banded_conv_weights(w2, W)

    kernel = functools.partial(basic_block_kernel, H=H, W=W, C=Cout)

    out = pl.pallas_call(
        kernel,
        out_shape=jax.ShapeDtypeStruct((N * H, W * Cout), jnp.float32),
        in_specs=[pl.BlockSpec(memory_space=pltpu.MemorySpace.VMEM)] * 7,
        out_specs=pl.BlockSpec(memory_space=pltpu.MemorySpace.VMEM),
        # Explicit VMEM budget: well under v5e's 16 MiB scoped default and
        # v7x's 64 MiB physical; everything here is < 1 MiB resident.
        compiler_params=pltpu.CompilerParams(vmem_limit_bytes=32 * 1024 * 1024),
    )(x, B1, B2,
      g1.reshape(1, -1), b1.reshape(1, -1),
      g2.reshape(1, -1), b2.reshape(1, -1))

    out = out.reshape(N, H, W, Cout)
    return jnp.transpose(out, (0, 3, 1, 2))       # -> NCHW


def basic_block_reference(x_nchw, w1, g1, b1, w2, g2, b2):
    """Pure-JAX f32 reference (lax.conv) mirroring the PyTorch forward."""
    x = jnp.transpose(x_nchw, (0, 2, 3, 1)).astype(jnp.float32)
    dn = ('NHWC', 'HWIO', 'NHWC')

    def conv(y, w):
        return lax.conv_general_dilated(y, w, window_strides=(1, 1),
                                        padding=((1, 1), (1, 1)),
                                        dimension_numbers=dn)

    def bn(y, g, b):
        m = jnp.mean(y, axis=(0, 1, 2), keepdims=True)
        v = jnp.mean((y - m) ** 2, axis=(0, 1, 2), keepdims=True)
        return (y - m) / jnp.sqrt(v + EPS) * g.reshape(1, 1, 1, -1) + b.reshape(1, 1, 1, -1)

    out = jnp.maximum(bn(conv(x, w1), g1, b1), 0.0)
    out = bn(conv(out, w2), g2, b2)
    out = jnp.maximum(out + x, 0.0)
    return jnp.transpose(out, (0, 3, 1, 2))


if __name__ == "__main__":
    # Small, PyTorch-consistent shapes: inplanes == planes == 8, stride=1.
    # W * C = 16 * 8 = 128 -> lane-dense activations.
    N, C, H, W = 2, 8, 16, 16

    key = jax.random.PRNGKey(0)
    kx, kw1, kw2, kg1, kb1, kg2, kb2 = jax.random.split(key, 7)

    x = jax.random.normal(kx, (N, C, H, W), jnp.float32)
    w1 = 0.1 * jax.random.normal(kw1, (3, 3, C, C), jnp.float32)   # HWIO
    w2 = 0.1 * jax.random.normal(kw2, (3, 3, C, C), jnp.float32)
    g1 = 1.0 + 0.1 * jax.random.normal(kg1, (C,), jnp.float32)
    b1 = 0.1 * jax.random.normal(kb1, (C,), jnp.float32)
    g2 = 1.0 + 0.1 * jax.random.normal(kg2, (C,), jnp.float32)
    b2 = 0.1 * jax.random.normal(kb2, (C,), jnp.float32)

    out = basic_block_forward(x, w1, g1, b1, w2, g2, b2)
    out = jax.block_until_ready(out)

    ref = basic_block_reference(x, w1, g1, b1, w2, g2, b2)
    assert out.shape == (N, C, H, W)
    # Tolerance loosened vs. the pure-f32 version because conv operands are
    # now bf16 on the MXU (f32 accumulation); BN/residual/ReLU remain f32.
    assert jnp.allclose(out, ref, rtol=5e-2, atol=5e-2), \
        f"max abs diff {jnp.max(jnp.abs(out - ref))}"

    print("KERNEL_OK")
</pallas_src>

<mosaic_0001>
module attributes {stable_mosaic.version = 11 : i64} {
  func.func @basic_block_kernel(%arg0: memref<32x128xf32, #tpu.memory_space<vmem>>, %arg1: memref<384x128xbf16, #tpu.memory_space<vmem>>, %arg2: memref<384x128xbf16, #tpu.memory_space<vmem>>, %arg3: memref<1x8xf32, #tpu.memory_space<vmem>>, %arg4: memref<1x8xf32, #tpu.memory_space<vmem>>, %arg5: memref<1x8xf32, #tpu.memory_space<vmem>>, %arg6: memref<1x8xf32, #tpu.memory_space<vmem>>, %arg7: memref<32x128xf32, #tpu.memory_space<vmem>>) attributes {dimension_semantics = [], scalar_prefetch = 0 : i64, scratch_operands = 0 : i64, tpu.core_type = #tpu.core_type<tc>} {
    %c0 = arith.constant 0 : index
    %c0_0 = arith.constant 0 : index
    %0 = vector.load %arg0[%c0, %c0_0] : memref<32x128xf32, #tpu.memory_space<vmem>>, vector<32x128xf32>
    %1 = tpu.iota {dimensions = array<i32: 0>} : vector<32x128xi32>
    %c16_i32 = arith.constant 16 : i32
    %c0_i32 = arith.constant 0 : i32
    %2 = arith.cmpi eq, %c16_i32, %c0_i32 : i32
    %c1_i32 = arith.constant 1 : i32
    %3 = arith.select %2, %c1_i32, %c16_i32 : i32
    %4 = vector.broadcast %3 : i32 to vector<32x128xi32>
    %5 = arith.remsi %1, %4 : vector<32x128xi32>
    %c0_i32_1 = arith.constant 0 : i32
    %6 = vector.broadcast %c0_i32_1 : i32 to vector<32x128xi32>
    %7 = arith.cmpi ne, %5, %6 : vector<32x128xi32>
    %c0_i32_2 = arith.constant 0 : i32
    %8 = vector.broadcast %c0_i32_2 : i32 to vector<32x128xi32>
    %9 = arith.cmpi slt, %5, %8 : vector<32x128xi32>
    %c0_i32_3 = arith.constant 0 : i32
    %10 = arith.cmpi slt, %3, %c0_i32_3 : i32
    %11 = vector.broadcast %10 : i1 to vector<32x128xi1>
    %12 = vector.broadcast %11 : vector<32x128xi1> to vector<32x128xi1>
    %13 = arith.xori %9, %12 : vector<32x128xi1>
    %14 = arith.andi %13, %7 : vector<32x128xi1>
    %15 = vector.broadcast %3 : i32 to vector<32x128xi32>
    %16 = arith.addi %5, %15 : vector<32x128xi32>
    %17 = arith.select %14, %16, %5 : vector<32x128xi1>, vector<32x128xi32>
    %c0_i32_4 = arith.constant 0 : i32
    %18 = vector.broadcast %c0_i32_4 : i32 to vector<32x128xi32>
    %19 = arith.cmpi ne, %17, %18 : vector<32x128xi32>
    %c15_i32 = arith.constant 15 : i32
    %20 = vector.broadcast %c15_i32 : i32 to vector<32x128xi32>
    %21 = arith.cmpi ne, %17, %20 : vector<32x128xi32>
    %22 = tpu.iota {dimensions = array<i32: 0>} : vector<128x8xi32>
    %c8_i32 = arith.constant 8 : i32
    %c0_i32_5 = arith.constant 0 : i32
    %23 = arith.cmpi eq, %c8_i32, %c0_i32_5 : i32
    %c1_i32_6 = arith.constant 1 : i32
    %24 = arith.select %23, %c1_i32_6, %c8_i32 : i32
    %25 = vector.broadcast %24 : i32 to vector<128x8xi32>
    %26 = arith.remsi %22, %25 : vector<128x8xi32>
    %c0_i32_7 = arith.constant 0 : i32
    %27 = vector.broadcast %c0_i32_7 : i32 to vector<128x8xi32>
    %28 = arith.cmpi ne, %26, %27 : vector<128x8xi32>
    %c0_i32_8 = arith.constant 0 : i32
    %29 = vector.broadcast %c0_i32_8 : i32 to vector<128x8xi32>
    %30 = arith.cmpi slt, %26, %29 : vector<128x8xi32>
    %c0_i32_9 = arith.constant 0 : i32
    %31 = arith.cmpi slt, %24, %c0_i32_9 : i32
    %32 = vector.broadcast %31 : i1 to vector<128x8xi1>
    %33 = vector.broadcast %32 : vector<128x8xi1> to vector<128x8xi1>
    %34 = arith.xori %30, %33 : vector<128x8xi1>
    %35 = arith.andi %34, %28 : vector<128x8xi1>
    %36 = vector.broadcast %24 : i32 to vector<128x8xi32>
    %37 = arith.addi %26, %36 : vector<128x8xi32>
    %38 = arith.select %35, %37, %26 : vector<128x8xi1>, vector<128x8xi32>
    %39 = tpu.iota {dimensions = array<i32: 1>} : vector<128x8xi32>
    %40 = arith.cmpi eq, %38, %39 : vector<128x8xi32>
    %41 = arith.extui %40 : vector<128x8xi1> to vector<128x8xi32>
    %42 = arith.sitofp %41 : vector<128x8xi32> to vector<128x8xf32>
    %43 = tpu.iota {dimensions = array<i32: 1>} : vector<8x128xi32>
    %c8_i32_10 = arith.constant 8 : i32
    %c0_i32_11 = arith.constant 0 : i32
    %44 = arith.cmpi eq, %c8_i32_10, %c0_i32_11 : i32
    %c1_i32_12 = arith.constant 1 : i32
    %45 = arith.select %44, %c1_i32_12, %c8_i32_10 : i32
    %46 = vector.broadcast %45 : i32 to vector<8x128xi32>
    %47 = arith.remsi %43, %46 : vector<8x128xi32>
    %c0_i32_13 = arith.constant 0 : i32
    %48 = vector.broadcast %c0_i32_13 : i32 to vector<8x128xi32>
    %49 = arith.cmpi ne, %47, %48 : vector<8x128xi32>
    %c0_i32_14 = arith.constant 0 : i32
    %50 = vector.broadcast %c0_i32_14 : i32 to vector<8x128xi32>
    %51 = arith.cmpi slt, %47, %50 : vector<8x128xi32>
    %c0_i32_15 = arith.constant 0 : i32
    %52 = arith.cmpi slt, %45, %c0_i32_15 : i32
    %53 = vector.broadcast %52 : i1 to vector<8x128xi1>
    %54 = vector.broadcast %53 : vector<8x128xi1> to vector<8x128xi1>
    %55 = arith.xori %51, %54 : vector<8x128xi1>
    %56 = arith.andi %55, %49 : vector<8x128xi1>
    %57 = vector.broadcast %45 : i32 to vector<8x128xi32>
    %58 = arith.addi %47, %57 : vector<8x128xi32>
    %59 = arith.select %56, %58, %47 : vector<8x128xi1>, vector<8x128xi32>
    %60 = tpu.iota {dimensions = array<i32: 0>} : vector<8x128xi32>
    %61 = arith.cmpi eq, %59, %60 : vector<8x128xi32>
    %62 = arith.extui %61 : vector<8x128xi1> to vector<8x128xi32>
    %63 = arith.sitofp %62 : vector<8x128xi32> to vector<8x128xf32>
    %c1_i32_16 = arith.constant 1 : i32
    %64 = tpu.dynamic_rotate %0 by %c1_i32_16 dim 0 : vector<32x128xf32>, i32 -> vector<32x128xf32>
    %cst = arith.constant 0.000000e+00 : f32
    %65 = vector.broadcast %cst : f32 to vector<32x128xf32>
    %66 = arith.select %19, %64, %65 : vector<32x128xi1>, vector<32x128xf32>
    %c31_i32 = arith.constant 31 : i32
    %67 = tpu.dynamic_rotate %0 by %c31_i32 dim 0 : vector<32x128xf32>, i32 -> vector<32x128xf32>
    %cst_17 = arith.constant 0.000000e+00 : f32
    %68 = vector.broadcast %cst_17 : f32 to vector<32x128xf32>
    %69 = arith.select %21, %67, %68 : vector<32x128xi1>, vector<32x128xf32>
    %70 = tpu.concatenate %66, %0, %69 in 1 : vector<32x128xf32>, vector<32x128xf32>, vector<32x128xf32> -> vector<32x384xf32>
    %71 = arith.truncf %70 : vector<32x384xf32> to vector<32x384xbf16>
    %c0_18 = arith.constant 0 : index
    %c0_19 = arith.constant 0 : index
    %72 = vector.load %arg1[%c0_18, %c0_19] : memref<384x128xbf16, #tpu.memory_space<vmem>>, vector<384x128xbf16>
    %cst_20 = arith.constant dense<0.000000e+00> : vector<32x128xf32>
    %73 = tpu.matmul %71, %72, %cst_20 {dimension_numbers = #tpu.dot_dimension_numbers<[1], [0], [0], [1], [0, 0, 1, 1], [], []>} : vector<32x384xbf16>, vector<384x128xbf16>, vector<32x128xf32> -> vector<32x128xf32>
    %cst_21 = arith.constant dense<0.000000e+00> : vector<128xf32>
    %74 = vector.multi_reduction <add>, %73, %cst_21 [0] : vector<32x128xf32> to vector<128xf32>
    %75 = vector.shape_cast %74 : vector<128xf32> to vector<1x128xf32>
    %76 = arith.mulf %73, %73 : vector<32x128xf32>
    %cst_22 = arith.constant dense<0.000000e+00> : vector<128xf32>
    %77 = vector.multi_reduction <add>, %76, %cst_22 [0] : vector<32x128xf32> to vector<128xf32>
    %78 = vector.shape_cast %77 : vector<128xf32> to vector<1x128xf32>
    %79 = tpu.concatenate %75, %78 in 0 : vector<1x128xf32>, vector<1x128xf32> -> vector<2x128xf32>
    %cst_23 = arith.constant dense<0.000000e+00> : vector<2x8xf32>
    %80 = tpu.matmul %79, %42, %cst_23 {dimension_numbers = #tpu.dot_dimension_numbers<[1], [0], [0], [1], [0, 0, 1, 1], [], []>} : vector<2x128xf32>, vector<128x8xf32>, vector<2x8xf32> -> vector<2x8xf32>
    %cst_24 = arith.constant 0.001953125 : f32
    %81 = vector.broadcast %cst_24 : f32 to vector<2x8xf32>
    %82 = arith.mulf %80, %81 : vector<2x8xf32>
    %83 = vector.extract_strided_slice %82 {offsets = [0, 0], sizes = [1, 8], strides = [1, 1]} : vector<2x8xf32> to vector<1x8xf32>
    %84 = vector.extract_strided_slice %82 {offsets = [1, 0], sizes = [1, 8], strides = [1, 1]} : vector<2x8xf32> to vector<1x8xf32>
    %85 = arith.mulf %83, %83 : vector<1x8xf32>
    %86 = arith.subf %84, %85 : vector<1x8xf32>
    %cst_25 = arith.constant 9.99999974E-6 : f32
    %87 = vector.broadcast %cst_25 : f32 to vector<1x8xf32>
    %88 = arith.addf %86, %87 : vector<1x8xf32>
    %89 = math.rsqrt %88 : vector<1x8xf32>
    %c0_26 = arith.constant 0 : index
    %c0_27 = arith.constant 0 : index
    %90 = vector.load %arg3[%c0_26, %c0_27] : memref<1x8xf32, #tpu.memory_space<vmem>>, vector<1x8xf32>
    %91 = arith.mulf %89, %90 : vector<1x8xf32>
    %c0_28 = arith.constant 0 : index
    %c0_29 = arith.constant 0 : index
    %92 = vector.load %arg4[%c0_28, %c0_29] : memref<1x8xf32, #tpu.memory_space<vmem>>, vector<1x8xf32>
    %93 = arith.mulf %83, %91 : vector<1x8xf32>
    %94 = arith.subf %92, %93 : vector<1x8xf32>
    %95 = tpu.concatenate %91, %94 in 0 : vector<1x8xf32>, vector<1x8xf32> -> vector<2x8xf32>
    %cst_30 = arith.constant dense<0.000000e+00> : vector<2x128xf32>
    %96 = tpu.matmul %95, %63, %cst_30 {dimension_numbers = #tpu.dot_dimension_numbers<[1], [0], [0], [1], [0, 0, 1, 1], [], []>} : vector<2x8xf32>, vector<8x128xf32>, vector<2x128xf32> -> vector<2x128xf32>
    %97 = vector.extract_strided_slice %96 {offsets = [0, 0], sizes = [1, 128], strides = [1, 1]} : vector<2x128xf32> to vector<1x128xf32>
    %98 = vector.broadcast %97 : vector<1x128xf32> to vector<32x128xf32>
    %99 = arith.mulf %73, %98 : vector<32x128xf32>
    %100 = vector.extract_strided_slice %96 {offsets = [1, 0], sizes = [1, 128], strides = [1, 1]} : vector<2x128xf32> to vector<1x128xf32>
    %101 = vector.broadcast %100 : vector<1x128xf32> to vector<32x128xf32>
    %102 = arith.addf %99, %101 : vector<32x128xf32>
    %cst_31 = arith.constant 0.000000e+00 : f32
    %103 = vector.broadcast %cst_31 : f32 to vector<32x128xf32>
    %104 = arith.maximumf %102, %103 : vector<32x128xf32>
    %c1_i32_32 = arith.constant 1 : i32
    %105 = tpu.dynamic_rotate %104 by %c1_i32_32 dim 0 : vector<32x128xf32>, i32 -> vector<32x128xf32>
    %cst_33 = arith.constant 0.000000e+00 : f32
    %106 = vector.broadcast %cst_33 : f32 to vector<32x128xf32>
    %107 = arith.select %19, %105, %106 : vector<32x128xi1>, vector<32x128xf32>
    %c31_i32_34 = arith.constant 31 : i32
    %108 = tpu.dynamic_rotate %104 by %c31_i32_34 dim 0 : vector<32x128xf32>, i32 -> vector<32x128xf32>
    %cst_35 = arith.constant 0.000000e+00 : f32
    %109 = vector.broadcast %cst_35 : f32 to vector<32x128xf32>
    %110 = arith.select %21, %108, %109 : vector<32x128xi1>, vector<32x128xf32>
    %111 = tpu.concatenate %107, %104, %110 in 1 : vector<32x128xf32>, vector<32x128xf32>, vector<32x128xf32> -> vector<32x384xf32>
    %112 = arith.truncf %111 : vector<32x384xf32> to vector<32x384xbf16>
    %c0_36 = arith.constant 0 : index
    %c0_37 = arith.constant 0 : index
    %113 = vector.load %arg2[%c0_36, %c0_37] : memref<384x128xbf16, #tpu.memory_space<vmem>>, vector<384x128xbf16>
    %cst_38 = arith.constant dense<0.000000e+00> : vector<32x128xf32>
    %114 = tpu.matmul %112, %113, %cst_38 {dimension_numbers = #tpu.dot_dimension_numbers<[1], [0], [0], [1], [0, 0, 1, 1], [], []>} : vector<32x384xbf16>, vector<384x128xbf16>, vector<32x128xf32> -> vector<32x128xf32>
    %cst_39 = arith.constant dense<0.000000e+00> : vector<128xf32>
    %115 = vector.multi_reduction <add>, %114, %cst_39 [0] : vector<32x128xf32> to vector<128xf32>
    %116 = vector.shape_cast %115 : vector<128xf32> to vector<1x128xf32>
    %117 = arith.mulf %114, %114 : vector<32x128xf32>
    %cst_40 = arith.constant dense<0.000000e+00> : vector<128xf32>
    %118 = vector.multi_reduction <add>, %117, %cst_40 [0] : vector<32x128xf32> to vector<128xf32>
    %119 = vector.shape_cast %118 : vector<128xf32> to vector<1x128xf32>
    %120 = tpu.concatenate %116, %119 in 0 : vector<1x128xf32>, vector<1x128xf32> -> vector<2x128xf32>
    %cst_41 = arith.constant dense<0.000000e+00> : vector<2x8xf32>
    %121 = tpu.matmul %120, %42, %cst_41 {dimension_numbers = #tpu.dot_dimension_numbers<[1], [0], [0], [1], [0, 0, 1, 1], [], []>} : vector<2x128xf32>, vector<128x8xf32>, vector<2x8xf32> -> vector<2x8xf32>
    %cst_42 = arith.constant 0.001953125 : f32
    %122 = vector.broadcast %cst_42 : f32 to vector<2x8xf32>
    %123 = arith.mulf %121, %122 : vector<2x8xf32>
    %124 = vector.extract_strided_slice %123 {offsets = [0, 0], sizes = [1, 8], strides = [1, 1]} : vector<2x8xf32> to vector<1x8xf32>
    %125 = vector.extract_strided_slice %123 {offsets = [1, 0], sizes = [1, 8], strides = [1, 1]} : vector<2x8xf32> to vector<1x8xf32>
    %126 = arith.mulf %124, %124 : vector<1x8xf32>
    %127 = arith.subf %125, %126 : vector<1x8xf32>
    %cst_43 = arith.constant 9.99999974E-6 : f32
    %128 = vector.broadcast %cst_43 : f32 to vector<1x8xf32>
    %129 = arith.addf %127, %128 : vector<1x8xf32>
    %130 = math.rsqrt %129 : vector<1x8xf32>
    %c0_44 = arith.constant 0 : index
    %c0_45 = arith.constant 0 : index
    %131 = vector.load %arg5[%c0_44, %c0_45] : memref<1x8xf32, #tpu.memory_space<vmem>>, vector<1x8xf32>
    %132 = arith.mulf %130, %131 : vector<1x8xf32>
    %c0_46 = arith.constant 0 : index
    %c0_47 = arith.constant 0 : index
    %133 = vector.load %arg6[%c0_46, %c0_47] : memref<1x8xf32, #tpu.memory_space<vmem>>, vector<1x8xf32>
    %134 = arith.mulf %124, %132 : vector<1x8xf32>
    %135 = arith.subf %133, %134 : vector<1x8xf32>
    %136 = tpu.concatenate %132, %135 in 0 : vector<1x8xf32>, vector<1x8xf32> -> vector<2x8xf32>
    %cst_48 = arith.constant dense<0.000000e+00> : vector<2x128xf32>
    %137 = tpu.matmul %136, %63, %cst_48 {dimension_numbers = #tpu.dot_dimension_numbers<[1], [0], [0], [1], [0, 0, 1, 1], [], []>} : vector<2x8xf32>, vector<8x128xf32>, vector<2x128xf32> -> vector<2x128xf32>
    %138 = vector.extract_strided_slice %137 {offsets = [0, 0], sizes = [1, 128], strides = [1, 1]} : vector<2x128xf32> to vector<1x128xf32>
    %139 = vector.broadcast %138 : vector<1x128xf32> to vector<32x128xf32>
    %140 = arith.mulf %114, %139 : vector<32x128xf32>
    %141 = vector.extract_strided_slice %137 {offsets = [1, 0], sizes = [1, 128], strides = [1, 1]} : vector<2x128xf32> to vector<1x128xf32>
    %142 = vector.broadcast %141 : vector<1x128xf32> to vector<32x128xf32>
    %143 = arith.addf %140, %142 : vector<32x128xf32>
    %144 = arith.addf %143, %0 : vector<32x128xf32>
    %cst_49 = arith.constant 0.000000e+00 : f32
    %145 = vector.broadcast %cst_49 : f32 to vector<32x128xf32>
    %146 = arith.maximumf %144, %145 : vector<32x128xf32>
    %c0_50 = arith.constant 0 : index
    %c0_51 = arith.constant 0 : index
    %147 = vector.load %arg7[%c0_50, %c0_51] : memref<32x128xf32, #tpu.memory_space<vmem>>, vector<32x128xf32>
    tpu.vector_store %arg7[%c0_50, %c0_51], %146 {strides = array<i32>} : memref<32x128xf32, #tpu.memory_space<vmem>>, vector<32x128xf32>,
    return
  }
}

</mosaic_0001>

<bundles_post_ra>
// kernel: tpu_custom_call.1
= control target key start
LH: loop header
LB: loop body
LE: loop exit
PB: predicated region body
PF: predicated region fallthrough
CT: control target
= control target key end

     0   :  { %12 = vsyncpa [#allocation3], 0  ;;  %s2633_s0 = inlined_call_operand.hbm [shape: f32[32,128], index: 0, kind: input, shape index: {}]   ;;  %s2634_s1 = inlined_call_operand.hbm [shape: bf16[384,128], index: 1, kind: input, shape index: {}]   ;;  %s2635_s2 = inlined_call_operand.hbm [shape: bf16[384,128], index: 2, kind: input, shape index: {}]   ;;  %s2636_s3 = inlined_call_operand.vmem [shape: f32[1,8], index: 3, kind: input, shape index: {}]   ;;  %s2637_s4 = inlined_call_operand.vmem [shape: f32[1,8], index: 4, kind: input, shape index: {}]   ;;  %s2638_s5 = inlined_call_operand.vmem [shape: f32[1,8], index: 5, kind: input, shape index: {}]   ;;  %s2639_s6 = inlined_call_operand.vmem [shape: f32[1,8], index: 6, kind: input, shape index: {}]   ;;  %s2640_s7 = inlined_call_operand.hbm [shape: f32[32,128], index: 7, kind: output, shape index: {}]  }
   0x1   :  { %13 = vsyncpa [#allocation6], 0 }
   0x2   :  { %14 = vsyncpa [#allocation4], 0  ;;  %s2072_s24 = smov [#allocation5]   ;;  %s1978_s28 = scalar_lea.hbm %s2634_s1, 3072 }
   0x3   :  { %s32_s25 = sshll.u32 %s2072_s24, 4  ;;  %p1979_p0 = scmp.ne.s32.totalorder %s2634_s1, %s1978_s28  ;;  %s33_s25 = int_to_ptr.vmem [resolvable:$true] %s32_s25 }
   0x4   :  { %p1982_p1 = scmp.lt.u32.totalorder %s1978_s28, %s2634_s1 }
   0x6   :  { %p1984_p2 = pnand %p1982_p1, %p1979_p0 }
   0x8   :  { %1987 = shalt.err (!%p1984_p2)
}
   0x9   :  { %s1988_s10 = scalar_lea.vmem %s33_s25, 3072  ;;  %p1993_p4 = scmp.lt.s32.totalorder %s33_s25, %s33_s25 }
   0xa   :  { %p1989_p3 = scmp.ne.s32.totalorder %s33_s25, %s1988_s10  ;;  %p1994_p5 = scmp.lt.s32.totalorder %s1988_s10, %s1988_s10 }
   0xc   :  { %p1995_p6 = por %p1994_p5, %p1993_p4 }
   0xe   :  { %p1996_p7 = pnand %p1995_p6, %p1989_p3 }
  0x10   :  { %1999 = shalt.err (!%p1996_p7)
}
  0x11   :  { %s2073_s11 = smov 64   ;;  %s2074_s12 = smov 4  }
  0x12   :  { %38 = dma.hbm_to_vmem [thread:$0]  %s2634_s1, 3072, %s33_s25, [#allocation6], %s2073_s11, %s2073_s11, %s2074_s12  }
  0x13   :  { %s2075_s15 = smov [#allocation2]   ;;  %s2000_s19 = scalar_lea.hbm %s2633_s0, 512 }
  0x14   :  { %s20_s16 = sshll.u32 %s2075_s15, 4  ;;  %p2001_p8 = scmp.ne.s32.totalorder %s2633_s0, %s2000_s19  ;;  %s21_s16 = int_to_ptr.vmem [resolvable:$true] %s20_s16 }
  0x15   :  { %p2004_p9 = scmp.lt.u32.totalorder %s2000_s19, %s2633_s0 }
  0x17   :  { %p2006_p10 = pnand %p2004_p9, %p2001_p8 }
  0x19   :  { %2009 = shalt.err (!%p2006_p10)
}
  0x1a   :  { %s2010_s24 = scalar_lea.vmem %s21_s16, 512  ;;  %p2015_p12 = scmp.lt.s32.totalorder %s21_s16, %s21_s16 }
  0x1b   :  { %p2011_p11 = scmp.ne.s32.totalorder %s21_s16, %s2010_s24  ;;  %p2016_p13 = scmp.lt.s32.totalorder %s2010_s24, %s2010_s24 }
  0x1d   :  { %p2017_p0 = por %p2016_p13, %p2015_p12 }
  0x1f   :  { %p2018_p1 = pnand %p2017_p0, %p2011_p11 }
  0x21   :  { %2021 = shalt.err (!%p2018_p1)
}
  0x22   :  { %s2076_s1 = smov 128   ;;  %s2077_s25 = smov 8  }
  0x23   :  { %26 = dma.hbm_to_vmem [thread:$0]  %s2633_s0, 512, %s21_s16, [#allocation3], %s2076_s1, %s2076_s1, %s2077_s25  }
  0x24   :  { %s2078_s28 = smov [#allocation7]   ;;  %s2022_s9 = scalar_lea.hbm %s2635_s2, 3072 }
  0x25   :  { %s44_s29 = sshll.u32 %s2078_s28, 4  ;;  %p2023_p2 = scmp.ne.s32.totalorder %s2635_s2, %s2022_s9  ;;  %s45_s29 = int_to_ptr.vmem [resolvable:$true] %s44_s29 }
  0x26   :  { %p2026_p3 = scmp.lt.u32.totalorder %s2022_s9, %s2635_s2 }
  0x28   :  { %p2028_p4 = pnand %p2026_p3, %p2023_p2 }
  0x2a   :  { %2031 = shalt.err (!%p2028_p4)
}
  0x2b   :  { %s2032_s17 = scalar_lea.vmem %s45_s29, 3072  ;;  %p2037_p6 = scmp.lt.s32.totalorder %s45_s29, %s45_s29 }
  0x2c   :  { %p2033_p5 = scmp.ne.s32.totalorder %s45_s29, %s2032_s17  ;;  %p2038_p7 = scmp.lt.s32.totalorder %s2032_s17, %s2032_s17 }
  0x2e   :  { %p2039_p8 = por %p2038_p7, %p2037_p6 }
  0x30   :  { %p2040_p9 = pnand %p2039_p8, %p2033_p5 }
  0x32   :  { %2043 = shalt.err (!%p2040_p9)
}
  0x33   :  { %50 = dma.hbm_to_vmem [thread:$0]  %s2635_s2, 3072, %s45_s29, [#allocation6], %s2073_s11, %s2073_s11, %s2074_s12  }
  0x34   :  { %2066 = dma.done.wait [#allocation3], 512  }
  0x35   :  { %2067 = vsyncadd [#allocation3], 4294966784 }
  0x36   :  { %2068 = dma.done.wait [#allocation6], 6144  }
  0x37   :  { %2069 = vsyncadd [#allocation6], 4294961152  ;;  %v1926_v0 = vld [vmem:[#allocation5 + $0x40] sm:$0xff]   ;;  %v1929_v3 = vld [vmem:[#allocation5 + $0x48] sm:$0xff]   ;;  %v73_v8 = vlaneseq  ;;  %vm2079_vm5 = vmmov 1   ;;  %v2696_v30 = vmov 0 }
  0x38   :  { %v1927_v1 = vld [vmem:[#allocation5] sm:$0xff]   ;;  %1630 = vmatprep.subr.bf16.mxu0 %v1926_v0  ;;  %v1930_v4 = vld [vmem:[#allocation5 + $0x8] sm:$0xff]   ;;  %v1932_v6 = vld [vmem:[#allocation5 + $0x50] sm:$0xff]  }
  0x39   :  { %v1928_v2 = vld [vmem:[#allocation5 + $0x80] sm:$0xff]   ;;  %1631 = vmatpush3.bf16.msra.mxu0 %v1927_v1  ;;  %v1931_v5 = vld [vmem:[#allocation5 + $0x88] sm:$0xff]   ;;  %v1933_v7 = vld [vmem:[#allocation5 + $0x10] sm:$0xff]   ;;  %v2172_v13 = vshrl.u32 %v73_v8, 7 }
  0x3a   :  { %1744 = vmatprep.subr.bf16.mxu1 %v1928_v2  ;;  %1632 = vmatprep.subr.bf16.mxu0 %v1929_v3  ;;  %v1934_v9 = vld [vmem:[#allocation5 + $0x90] sm:$0xff]   ;;  %v1935_v10 = vld [vmem:[#allocation5 + $0x58] sm:$0xff]   ;;  %v1938_v14 = vld [vmem:[#allocation5 + $0x60] sm:$0xff]  }
  0x3b   :  { %1745 = vmatpush3.bf16.msra.mxu1 %v1928_v2  ;;  %v1936_v11 = vld [vmem:[#allocation5 + $0x18] sm:$0xff]   ;;  %v1940_v15 = vld [vmem:[#allocation5 + $0xa0] sm:$0xff]   ;;  %v2175_v17 = vadd.s32 8, %v2172_v13  ;;  %v1941_v18 = vld [vmem:[#allocation5 + $0x68] sm:$0xff]   ;;  %v2178_v19 = vadd.s32 24, %v2172_v13  ;;  %v82_v20 = vand.u32 15, %v2172_v13 }
  0x3c   :  { %1746 = vmatprep.subr.bf16.mxu1 %v1931_v5  ;;  %v1937_v12 = vld [vmem:[#allocation5 + $0x98] sm:$0xff]   ;;  %v1939_v16 = vld [vmem:[#allocation5 + $0x20] sm:$0xff]   ;;  %v1943_v21 = vld [vmem:[#allocation5 + $0xa8] sm:$0xff]   ;;  %v2182_v22 = vadd.s32 16, %v2172_v13  ;;  %vm2646_vm0 = vcmp.lt.s32.totalorder %v2172_v13, 1  ;;  %vm2644_vm1 = vcmp.lt.s32.totalorder %v2172_v13, 7 }
  0x3d   :  { %1633 = vmatpush3.bf16.msra.mxu0 %v1930_v4  ;;  %v1942_v23 = vld [vmem:[#allocation5 + $0x28] sm:$0xff]   ;;  %v89_v24 = vand.u32 15, %v2175_v17  ;;  %v1944_v25 = vld [vmem:[#allocation5 + $0x70] sm:$0xff]   ;;  %v103_v26 = vand.u32 15, %v2178_v19  ;;  %v1947_v29 = vld [vmem:[#allocation5 + $0x78] sm:$0xff]   ;;  %vm2188_vm2 = vcmp.ne.s32.totalorder %v82_v20, 0 }
  0x3e   :  { %1634 = vmatprep.subr.bf16.mxu0 %v1932_v6  ;;  %v1945_v27 = vld [vmem:[#allocation5 + $0x30] sm:$0xff]   ;;  %v1949_v31 = vld [vmem:[#allocation5 + $0xb8] sm:$0xff]   ;;  %v2192_v32 = vld [vmem:[#allocation2] sm:$0xff]  ;;  %v96_v37 = vand.u32 15, %v2182_v22  ;;  %v157_v2 = vand.u32 7, %v2175_v17  ;;  %v150_v3 = vand.u32 7, %v2172_v13 }
  0x3f   :  { %1747 = vmatpush3.bf16.msra.mxu1 %v1931_v5  ;;  %v1946_v28 = vld [vmem:[#allocation5 + $0xb0] sm:$0xff]   ;;  %v2194_v33 = vld [vmem:[#allocation2 + $0x8] sm:$0xff]  ;;  %v2196_v34 = vld [vmem:[#allocation2 + $0x18] sm:$0xff]  ;;  %vm2198_vm3 = vcmp.ne.s32.totalorder %v89_v24, 15  ;;  %vm2202_vm4 = vcmp.ne.s32.totalorder %v103_v26, 15  ;;  %v403_v39 = vrot.slane %v2192_v32, 7 }
  0x40   :  { %1748 = vmatprep.subr.bf16.mxu1 %v1934_v9  ;;  %v1948_v38 = vld [vmem:[#allocation5 + $0x38] sm:$0xff]   ;;  %v404_v40 = vrot.slane %v2194_v33, 7  ;;  %v430_v41 = vpack.c.bf16 %v2194_v33, %v2192_v32  ;;  %v406_v42 = vrot.slane %v2196_v34, 7  ;;  %v2212_v43 = vld [vmem:[#allocation2 + $0x10] sm:$0xff]  ;;  %vm2217_vm6 = vmpackc.low %vm2079_vm5, %vm2188_vm2  ;;  %v416_v45 = vrot.slane %v2192_v32, 1 }
  0x41   :  { %1635 = vmatpush3.bf16.msra.mxu0 %v1933_v7  ;;  %v417_v46 = vrot.slane %v2194_v33, 1  ;;  %v418_v47 = vrot.slane %v2212_v43, 1  ;;  %v419_v48 = vrot.slane %v2196_v34, 1  ;;  %vm2232_vm7 = vmpackc.low %vm2198_vm3, %vm2079_vm5  ;;  %vm128_vm9 = vcmp.ne.s32.totalorder %v96_v37, 0 }
  0x42   :  { %1636 = vmatprep.subr.bf16.mxu0 %v1935_v10  ;;  %659 = vmatprep.mubr.bf16.mxu0 %v430_v41  ;;  %v410_v49 = vsel %vm2646_vm0, %v403_v39, %v404_v40  ;;  %v411_v50 = vsel %vm2646_vm0, %v406_v42, %v403_v39  ;;  %vm2243_vm8 = vmpackc.low %vm2202_vm4, %vm2079_vm5  ;;  %v405_v55 = vrot.slane %v2212_v43, 7  ;;  %v433_v60 = vpack.c.bf16 %v2196_v34, %v2212_v43 }
  0x43   :  { %1749 = vmatpush3.bf16.msra.mxu1 %v1934_v9  ;;  %v422_v52 = vsel %vm2644_vm1, %v417_v46, %v418_v47  ;;  %v423_v53 = vsel %vm2644_vm1, %v416_v45, %v417_v46  ;;  %v421_v57 = vsel %vm2644_vm1, %v418_v47, %v419_v48  ;;  %v424_v58 = vsel %vm2644_vm1, %v419_v48, %v416_v45  ;;  %vm2257_vm10 = vmpackc.low %vm2079_vm5, %vm128_vm9 }
  0x44   :  { %1750 = vmatprep.subr.bf16.mxu1 %v1937_v12  ;;  %v1551_v56 = vpack.c.bf16 %v422_v52, %v423_v53  ;;  %v1545_v59 = vpack.c.bf16 %v410_v49, %v411_v50  ;;  %v1554_v62 = vpack.c.bf16 %v424_v58, %v421_v57  ;;  %v408_v63 = vsel %vm2646_vm0, %v405_v55, %v406_v42 }
  0x45   :  { %1637 = vmatpush3.bf16.msra.mxu0 %v1936_v11  ;;  %v409_v0 = vsel %vm2646_vm0, %v404_v40, %v405_v55  ;;  %v2274_v4 = vand.u32 127, %v73_v8  ;;  %v2080_v7 = vmov 0.0|0.0   ;;  %v2081_v8 = vmov 1.0|1.0  }
  0x46   :  { %1638 = vmatprep.subr.bf16.mxu0 %v1938_v14  ;;  %1760 = vmatprep.mubr.msk.bf16.mxu1 %vm2232_vm7, %v1551_v56  ;;  %v1548_v1 = vpack.c.bf16 %v408_v63, %v409_v0  ;;  %v164_v9 = vand.u32 7, %v2182_v22  ;;  %v171_v10 = vand.u32 7, %v2178_v19  ;;  %v134_v14 = vadd.s32 32, %v2172_v13 }
  0x47   :  { %1751 = vmatpush3.bf16.msra.mxu1 %v1937_v12  ;;  %vm2277_vm11 = vcmp.eq.s32.totalorder %v150_v3, %v2274_v4  ;;  %vm2282_vm12 = vcmp.eq.s32.totalorder %v157_v2, %v2274_v4  ;;  %v136_v20 = vadd.s32 48, %v2172_v13  ;;  %v2692_v24 = vmov 0 }
  0x48   :  { %1752 = vmatprep.subr.bf16.mxu1 %v1940_v15  ;;  %vm2643_vm13 = vmpackc.low %vm2282_vm12, %vm2277_vm11  ;;  %vm2301_vm14 = vcmp.eq.s32.totalorder %v164_v9, %v2274_v4  ;;  %vm2306_vm15 = vcmp.eq.s32.totalorder %v171_v10, %v2274_v4  ;;  %v138_v26 = vadd.s32 64, %v2172_v13  ;;  %v140_v35 = vadd.s32 80, %v2172_v13 }
  0x49   :  { %1639 = vmatpush3.bf16.msra.mxu0 %v1939_v16  ;;  %vm2641_vm2 = vmpackc.low %vm2306_vm15, %vm2301_vm14  ;;  %v178_v16 = vand.u32 7, %v134_v14  ;;  %v192_v22 = vand.u32 7, %v136_v20  ;;  %v141_v36 = vadd.s32 88, %v2172_v13  ;;  %v2700_v39 = vmov 0 }
  0x4a   :  { %1640 = vmatprep.subr.bf16.mxu0 %v1941_v18  ;;  %v2688_v18 = vmov 0  ;;  %v220_v37 = vand.u32 7, %v140_v35  ;;  %v2702_v40 = vmov 0  ;;  %v142_v41 = vadd.s32 96, %v2172_v13 }
  0x4b   :  { %1753 = vmatpush3.bf16.msra.mxu1 %v1940_v15  ;;  %v135_v15 = vadd.s32 40, %v2172_v13  ;;  %vm2324_vm3 = vcmp.eq.s32.totalorder %v178_v16, %v2274_v4  ;;  %vm2347_vm9 = vcmp.eq.s32.totalorder %v192_v22, %v2274_v4  ;;  %v143_v42 = vadd.s32 104, %v2172_v13 }
  0x4c   :  { %1754 = vmatprep.subr.bf16.mxu1 %v1943_v21  ;;  %v2689_v18 = vsel %vm2324_vm3, 4294967295, %v2688_v18  ;;  %v2693_v24 = vsel %vm2347_vm9, 4294967295, %v2692_v24  ;;  %vm2393_vm0 = vcmp.eq.s32.totalorder %v220_v37, %v2274_v4  ;;  %v234_v45 = vand.u32 7, %v142_v41 }
  0x4d   :  { %1641 = vmatpush3.bf16.msra.mxu0 %v1942_v23  ;;  %v185_v17 = vand.u32 7, %v135_v15  ;;  %v2701_v39 = vsel %vm2393_vm0, 4294967295, %v2700_v39  ;;  %v241_v46 = vand.u32 7, %v143_v42  ;;  %v2704_v47 = vmov 0 }
  0x4e   :  { %1642 = vmatprep.subr.bf16.mxu0 %v1944_v25  ;;  %v2694_v25 = vmov 0  ;;  %v2706_v48 = vmov 0  ;;  %v144_v49 = vadd.s32 112, %v2172_v13  ;;  %v145_v50 = vadd.s32 120, %v2172_v13 }
  0x4f   :  { %1755 = vmatpush3.bf16.msra.mxu1 %v1943_v21  ;;  %vm2329_vm4 = vcmp.eq.s32.totalorder %v185_v17, %v2274_v4  ;;  %v137_v21 = vadd.s32 56, %v2172_v13  ;;  %v2083_v55 = vmov 0.0   ;;  %v2708_v56 = vmov 0 }
  0x50   :  { %1756 = vmatprep.subr.bf16.mxu1 %v1946_v28  ;;  %vm2642_vm5 = vmpackc.low %vm2329_vm4, %vm2324_vm3  ;;  %v248_v52 = vand.u32 7, %v144_v49  ;;  %v255_v53 = vand.u32 7, %v145_v50  ;;  %v2710_v57 = vmov 0 }
  0x51   :  { %1643 = vmatpush3.bf16.msra.mxu0 %v1945_v27  ;;  %v199_v23 = vand.u32 7, %v137_v21  ;;  %v139_v27 = vadd.s32 72, %v2172_v13 }
  0x52   :  { %1644 = vmatprep.subr.bf16.mxu0 %v1947_v29 }
  0x53   :  { %1757 = vmatpush3.bf16.msra.mxu1 %v1946_v28  ;;  %v206_v28 = vand.u32 7, %v138_v26  ;;  %v213_v29 = vand.u32 7, %v139_v27 }
  0x54   :  { %1758 = vmatprep.subr.bf16.mxu1 %v1949_v31 }
  0x55   :  { %1645 = vmatpush3.bf16.msra.mxu0 %v1948_v38  ;;  %vm2375_vm1 = vcmp.eq.s32.totalorder %v213_v29, %v2274_v4  ;;  %v227_v38 = vand.u32 7, %v141_v36 }
  0x56   :  { %1864 = vmatprep.subr.bf16.mxu0 %v2080_v7 }
  0x57   :  { %1759 = vmatpush3.bf16.msra.mxu1 %v1949_v31  ;;  %v2698_v31 = vmov 0 }
  0x58   :  { %1546 = vmatmul.mubr.msk.bf16.vlgmr.msra.gmra.mrb[0].mxu0 %vm2217_vm6, %v1545_v59  ;;  %v2699_v31 = vsel %vm2375_vm1, 4294967295, %v2698_v31  ;;  %1799 = vmatprep.subr.mxu1 %v2083_v55 }
  0x59   :  { %667 = vmatprep.mubr.bf16.mxu0 %v433_v60  ;;  %1866 = vmatpush3.bf16.msk.msra.mxu0 %vm2643_vm13, %v2081_v8  ;;  %vm2370_vm13 = vcmp.eq.s32.totalorder %v206_v28, %v2274_v4 }
  0x5a   :  { %1761 = vmatmul.mubr.msk.bf16.vlgmr.msra.gmra.mrb[0].mxu1 %vm2243_vm8, %v1554_v62  ;;  %1867 = vmatprep.subr.bf16.mxu0 %v2080_v7  ;;  %v2697_v30 = vsel %vm2370_vm13, 4294967295, %v2696_v30 }
  0x5d   :  { %1869 = vmatpush3.bf16.msk.msra.mxu0 %vm2641_vm2, %v2081_v8  ;;  %vm2352_vm2 = vcmp.eq.s32.totalorder %v199_v23, %v2274_v4 }
  0x5e   :  { %1870 = vmatprep.subr.bf16.mxu0 %v2080_v7  ;;  %v2695_v25 = vsel %vm2352_vm2, 4294967295, %v2694_v25 }
  0x60   :  { %1549 = vmatmul.mubr.msk.bf16.gmra.mrb[4].mxu0 %vm2257_vm10, %v1548_v1 }
  0x61   :  { %1872 = vmatpush3.bf16.msk.msra.mxu0 %vm2642_vm5, %v2081_v8  ;;  %vm2645_vm5 = vmpackc.low %vm2352_vm2, %vm2347_vm9  ;;  %vm2398_vm9 = vcmp.eq.s32.totalorder %v227_v38, %v2274_v4  ;;  %vm2447_vm2 = vcmp.eq.s32.totalorder %v255_v53, %v2274_v4 }
  0x62   :  { %1873 = vmatprep.subr.bf16.mxu0 %v2080_v7  ;;  %v2703_v40 = vsel %vm2398_vm9, 4294967295, %v2702_v40  ;;  %v2711_v57 = vsel %vm2447_vm2, 4294967295, %v2710_v57 }
  0x65   :  { %1875 = vmatpush3.bf16.msk.msra.mxu0 %vm2645_vm5, %v2081_v8  ;;  %vm2648_vm5 = vmpackc.low %vm2375_vm1, %vm2370_vm13  ;;  %vm2416_vm13 = vcmp.eq.s32.totalorder %v234_v45, %v2274_v4  ;;  %vm2421_vm1 = vcmp.eq.s32.totalorder %v241_v46, %v2274_v4 }
  0x66   :  { %1876 = vmatprep.subr.bf16.mxu0 %v2080_v7  ;;  %v2705_v47 = vsel %vm2416_vm13, 4294967295, %v2704_v47  ;;  %v2707_v48 = vsel %vm2421_vm1, 4294967295, %v2706_v48 }
  0x69   :  { %1878 = vmatpush3.bf16.msk.msra.mxu0 %vm2648_vm5, %v2081_v8  ;;  %vm2651_vm5 = vmpackc.low %vm2398_vm9, %vm2393_vm0  ;;  %vm2657_vm0 = vmmov 0   ;;  %vm2442_vm9 = vcmp.eq.s32.totalorder %v248_v52, %v2274_v4 }
  0x6a   :  { %1879 = vmatprep.subr.bf16.mxu0 %v2080_v7  ;;  %1796 = vmatprep.mubr.msk.f32.mxu0 %vm2657_vm0, %v2083_v55  ;;  %v2709_v56 = vsel %vm2442_vm9, 4294967295, %v2708_v56 }
  0x6b   :  { %1801 = vmatprep.mubr.msk.f32.mxu1 %vm2657_vm0, %v2083_v55 }
  0x6d   :  { %1881 = vmatpush3.bf16.msk.msra.mxu0 %vm2651_vm5, %v2081_v8  ;;  %vm2655_vm5 = vmpackc.low %vm2421_vm1, %vm2416_vm13 }
  0x6e   :  { %1882 = vmatprep.subr.bf16.mxu0 %v2080_v7 }
  0x71   :  { %1884 = vmatpush3.bf16.msk.msra.mxu0 %vm2655_vm5, %v2081_v8  ;;  %vm2656_vm5 = vmpackc.low %vm2447_vm2, %vm2442_vm9  ;;  %vm2714_vm9 = vcmask 1040384   ;;  %vm2717_vm2 = vcmp.lt.s32.totalorder %v2172_v13, 7 }
  0x72   :  { %1885 = vmatprep.subr.bf16.mxu0 %v2080_v7  ;;  %vm2718_vm13 = vmmov %vm2717_vm2 }
  0x73   :  { %vm2719_vm1 = vmmov %vm2717_vm2 }
  0x74   :  { %vm2720_vm3 = vmmov %vm2719_vm1 }
  0x75   :  { %1887 = vmatpush3.bf16.msk.msra.mxu0 %vm2656_vm5, %v2081_v8  ;;  %vm2659_vm5 = vcmask 1040384  }
 0x12b   :  { %v1646_v58 = vpop.f32.mrb[0].mxu0 }
 0x12c   :  { %v1647_v59 = vpop.f32.mrb[1].mxu0 }
 0x12d   :  { %v1648_v60 = vadd.f32 %v1647_v59, %v1646_v58  ;;  %v1649_v62 = vpop.f32.mrb[2].mxu0  ;;  %v1762_v63 = vpop.f32.mrb[0].mxu1 }
 0x12e   :  { %v1650_v0 = vpop.f32.mrb[3].mxu0  ;;  %v710_v1 = vpop.f32.mrb[1].mxu1 }
 0x12f   :  { %v1651_v2 = vadd.f32 %v1650_v0, %v1649_v62  ;;  %v2463_v3 = vadd.f32 %v1648_v60, %v710_v1  ;;  %v1763_v9 = vpop.f32.mrb[2].mxu1 }
 0x130   :  { %v713_v10 = vpop.f32.mrb[3].mxu1 }
 0x131   :  { %v2465_v14 = vadd.f32 %v1651_v2, %v713_v10  ;;  %v734_v23 = vmul.f32 %v2463_v3, %v2463_v3 }
 0x133   :  { %v1652_v15 = vpop.f32.mrb[4].mxu0  ;;  %v735_v17 = vmul.f32 %v2465_v14, %v2465_v14  ;;  %v725_v26 = vadd.f32 %v2465_v14, %v2463_v3 }
 0x134   :  { %v1653_v16 = vpop.f32.mrb[5].mxu0 }
 0x135   :  { %v1654_v20 = vadd.f32 %v1653_v16, %v1652_v15  ;;  %v1655_v21 = vpop.f32.mrb[6].mxu0  ;;  %v738_v29 = vadd.f32 %v735_v17, %v734_v23  ;;  %v2084_v15 = vmov 1.0   ;;  %v1950_v16 = vld [vmem:[#allocation7 + $0x40] sm:$0xff]  }
 0x136   :  { %v1656_v22 = vpop.f32.mrb[7].mxu0  ;;  %v1952_v17 = vld [vmem:[#allocation7 + $0x80] sm:$0xff]  }
 0x137   :  { %v2473_v27 = vadd.f32 %v1762_v63, %v1654_v20  ;;  %v1657_v28 = vadd.f32 %v1656_v22, %v1655_v21  ;;  %1804 = vmatprep.subr.bf16.mxu0 %v1952_v17  ;;  %v1955_v20 = vld [vmem:[#allocation7 + $0x88] sm:$0xff]   ;;  %v1958_v21 = vld [vmem:[#allocation7 + $0x90] sm:$0xff]   ;;  %v1964_v22 = vld [vmem:[#allocation7 + $0xa0] sm:$0xff]  }
 0x139   :  { %v726_v35 = vadd.f32 %v725_v26, %v2473_v27  ;;  %v736_v36 = vmul.f32 %v2473_v27, %v2473_v27  ;;  %v2478_v37 = vadd.f32 %v1763_v9, %v1657_v28  ;;  %v392_v9 = vand.u32 7, %v2274_v4  ;;  %v1961_v4 = vld [vmem:[#allocation7 + $0x98] sm:$0xff]  }
 0x13b   :  { %v739_v38 = vadd.f32 %v738_v29, %v736_v36  ;;  %v727_v41 = vadd.f32 %v726_v35, %v2478_v37  ;;  %v737_v42 = vmul.f32 %v2478_v37, %v2478_v37  ;;  %vm2486_vm0 = vcmp.eq.s32.totalorder %v392_v9, %v2172_v13  ;;  %v1960_v9 = vld [vmem:[#allocation7 + $0x18] sm:$0xff]  }
 0x13c   :  { %1800 = vmatpush3.msk.msra.mxu1 %vm2486_vm0, %v2084_v15 }
 0x13d   :  { %v728_v45 = vrot.slane %v727_v41, 4  ;;  %v740_v46 = vadd.f32 %v739_v38, %v737_v42  ;;  %1687 = vmatprep.subr.bf16.mxu1 %v1950_v16  ;;  %v1962_v16 = vld [vmem:[#allocation7 + $0x60] sm:$0xff]  }
 0x13f   :  { %v729_v49 = vadd.f32 %v728_v45, %v727_v41  ;;  %v741_v50 = vrot.slane %v740_v46, 4  ;;  %v1572_v41 = vld [vmem:[%s2636_s3] ss:$0 sm:$0xff] }
 0x141   :  { %v730_v52 = vrot.slane %v729_v49, 2  ;;  %v742_v53 = vadd.f32 %v741_v50, %v740_v46 }
 0x143   :  { %v731_v58 = vadd.f32 %v730_v52, %v729_v49  ;;  %v743_v59 = vrot.slane %v742_v53, 2  ;;  %v835_v49 = vld [vmem:[%s2637_s4] sm:$0x1]  ;;  %v2500_v52 = vsub.s32 0, %v2172_v13 }
 0x145   :  { %v732_v60 = vrot.slane %v731_v58, 1  ;;  %v744_v62 = vadd.f32 %v743_v59, %v742_v53  ;;  %v1951_v59 = vld [vmem:[#allocation7] sm:$0xff]  }
 0x147   :  { %v745_v63 = vrot.slane %v744_v62, 1  ;;  %v733_v0 = vadd.f32 %v732_v60, %v731_v58  ;;  %v1953_v60 = vld [vmem:[#allocation7 + $0x48] sm:$0xff]  }
 0x149   :  { %v746_v1 = vadd.f32 %v745_v63, %v744_v62  ;;  %v1954_v63 = vld [vmem:[#allocation7 + $0x8] sm:$0xff]  }
 0x14b   :  { %v748_v2 = vsel %vm2659_vm5, %v733_v0, %v746_v1  ;;  %vm2661_vm5 = vcmask 64512   ;;  %v1956_v0 = vld [vmem:[#allocation7 + $0x50] sm:$0xff]  }
 0x14c   :  { %1797 = vmatmul.mubr.f32.vlgmr.msra.gmra.mrb[8].mxu0 %v748_v2  ;;  %v1957_v1 = vld [vmem:[#allocation7 + $0x10] sm:$0xff]   ;;  %v1959_v2 = vld [vmem:[#allocation7 + $0x58] sm:$0xff]  }
 0x14d   :  { %1805 = vmatpush3.bf16.msra.mxu0 %v1952_v17  ;;  %v1963_v17 = vld [vmem:[#allocation7 + $0x20] sm:$0xff]  }
 0x14e   :  { %1806 = vmatprep.subr.bf16.mxu0 %v1955_v20 }
 0x151   :  { %1807 = vmatpush3.bf16.msra.mxu0 %v1955_v20  ;;  %v1965_v20 = vld [vmem:[#allocation7 + $0x68] sm:$0xff]  }
 0x152   :  { %1808 = vmatprep.subr.bf16.mxu0 %v1958_v21 }
 0x155   :  { %1809 = vmatpush3.bf16.msra.mxu0 %v1958_v21  ;;  %v1966_v21 = vld [vmem:[#allocation7 + $0x28] sm:$0xff]  }
 0x156   :  { %1810 = vmatprep.subr.bf16.mxu0 %v1961_v4 }
 0x159   :  { %1811 = vmatpush3.bf16.msra.mxu0 %v1961_v4  ;;  %v1967_v4 = vld [vmem:[#allocation7 + $0xa8] sm:$0xff]  }
 0x15a   :  { %1812 = vmatprep.subr.bf16.mxu0 %v1964_v22 }
 0x15d   :  { %1813 = vmatpush3.bf16.msra.mxu0 %v1964_v22  ;;  %v1968_v22 = vld [vmem:[#allocation7 + $0x70] sm:$0xff]  }
 0x15e   :  { %1814 = vmatprep.subr.bf16.mxu0 %v1967_v4 }
 0x161   :  { %1815 = vmatpush3.bf16.msra.mxu0 %v1967_v4 }
 0x21f   :  { %v815_v23 = vpop.f32.mrb[8].mxu0 }
 0x220   :  { %v819_v26 = vmul.f32 0.001953125, %v815_v23  ;;  %v1798_v28 = vpop.f32.mrb[9].mxu0  ;;  %v1969_v23 = vld [vmem:[#allocation7 + $0x30] sm:$0xff]  }
 0x221   :  { %v1971_v28 = vld [vmem:[#allocation7 + $0x78] sm:$0xff]  }
 0x222   :  { %v820_v29 = vmul.f32 %v819_v26, %v819_v26 }
 0x224   :  { %v822_v35 = vrot.slane %v820_v29, 7  ;;  %v1972_v29 = vld [vmem:[#allocation7 + $0x38] sm:$0xff]  }
 0x226   :  { %v824_v36 = vsub.f32 %v819_v26, %v822_v35  ;;  %v1973_v35 = vld [vmem:[#allocation7 + $0xb8] sm:$0xff]  }
 0x228   :  { %v825_v38 = vadd.f32 1e-05, %v824_v36  ;;  %v932_v36 = vsub.s32 1, %v2172_v13 }
 0x22a   :  { %1974 = vrsqrt.f32 %v825_v38 }
 0x234   :  { %v1975_v42 = vpop.eup %1974 }
 0x235   :  { %v834_v45 = vmul.f32 %v1975_v42, %v1572_v41 }
 0x237   :  { %v837_v46 = vrot.slane %v834_v45, 1 }
 0x239   :  { %v839_v50 = vmul.f32 %v837_v46, %v819_v26  ;;  %v1970_v26 = vld [vmem:[#allocation7 + $0xb0] sm:$0xff]  }
 0x23a   :  { %1816 = vmatprep.subr.bf16.mxu0 %v1970_v26 }
 0x23b   :  { %v840_v53 = vsub.f32 %v835_v49, %v839_v50  ;;  %1817 = vmatpush3.bf16.msra.mxu0 %v1970_v26 }
 0x23c   :  { %1818 = vmatprep.subr.bf16.mxu0 %v1973_v35 }
 0x23d   :  { %v845_v58 = vrot.slane %v840_v53, %v2500_v52 }
 0x23f   :  { %v847_v62 = vsel %vm2714_vm9, %v837_v46, %v845_v58  ;;  %1819 = vmatpush3.bf16.msra.mxu0 %v1973_v35  ;;  %vm2715_vm9 = vcmp.lt.s32.totalorder %v2172_v13, 1 }
 0x240   :  { %1802 = vmatmul.mubr.msk.f32.vlgmr.msra.gmra.mrb[4].mxu1 %vm2661_vm5, %v847_v62  ;;  %1859 = vmatprep.subr.mxu0 %v2083_v55  ;;  %vm2716_vm5 = vmmov %vm2715_vm9 }
 0x241   :  { %1688 = vmatpush3.bf16.msra.mxu1 %v1951_v59 }
 0x242   :  { %1689 = vmatprep.subr.bf16.mxu1 %v1953_v60 }
 0x245   :  { %1690 = vmatpush3.bf16.msra.mxu1 %v1954_v63 }
 0x246   :  { %1691 = vmatprep.subr.bf16.mxu1 %v1956_v0 }
 0x249   :  { %1692 = vmatpush3.bf16.msra.mxu1 %v1957_v1 }
 0x24a   :  { %1693 = vmatprep.subr.bf16.mxu1 %v1959_v2 }
 0x24d   :  { %1694 = vmatpush3.bf16.msra.mxu1 %v1960_v9 }
 0x24e   :  { %1695 = vmatprep.subr.bf16.mxu1 %v1962_v16 }
 0x251   :  { %1696 = vmatpush3.bf16.msra.mxu1 %v1963_v17 }
 0x252   :  { %1697 = vmatprep.subr.bf16.mxu1 %v1965_v20 }
 0x255   :  { %1698 = vmatpush3.bf16.msra.mxu1 %v1966_v21 }
 0x256   :  { %1699 = vmatprep.subr.bf16.mxu1 %v1968_v22 }
 0x259   :  { %1700 = vmatpush3.bf16.msra.mxu1 %v1969_v23 }
 0x25a   :  { %1701 = vmatprep.subr.bf16.mxu1 %v1971_v28 }
 0x25d   :  { %1702 = vmatpush3.bf16.msra.mxu1 %v1972_v29 }
 0x25e   :  { %1888 = vmatprep.subr.bf16.mxu1 %v2080_v7 }
 0x313   :  { %v918_v38 = vpop.f32.mrb[4].mxu1 }
 0x314   :  { %v925_v41 = vrot.slane %v918_v38, %v2500_v52  ;;  %v1803_v42 = vpop.f32.mrb[5].mxu1  ;;  %v933_v45 = vrot.slane %v918_v38, %v932_v36 }
 0x316   :  { %v926_v46 = vmul.f32 %v925_v41, %v2463_v3  ;;  %v927_v49 = vmul.f32 %v925_v41, %v2465_v14  ;;  %v928_v50 = vmul.f32 %v925_v41, %v2473_v27  ;;  %v929_v53 = vmul.f32 %v925_v41, %v2478_v37 }
 0x318   :  { %v936_v58 = vadd.f32 %v933_v45, %v928_v50  ;;  %v937_v59 = vadd.f32 %v933_v45, %v929_v53  ;;  %v934_v60 = vadd.f32 %v933_v45, %v926_v46  ;;  %v935_v62 = vadd.f32 %v933_v45, %v927_v49 }
 0x31a   :  { %v940_v63 = vmax.f32 %v936_v58, 0.0  ;;  %v941_v0 = vmax.f32 %v937_v59, 0.0  ;;  %v938_v1 = vmax.f32 %v934_v60, 0.0  ;;  %v939_v2 = vmax.f32 %v935_v62, 0.0 }
 0x31c   :  { %v945_v9 = vrot.slane %v941_v0, 7  ;;  %v957_v16 = vrot.slane %v941_v0, 1  ;;  %v942_v17 = vrot.slane %v938_v1, 7  ;;  %v943_v20 = vrot.slane %v939_v2, 7 }
 0x31d   :  { %v967_v21 = vpack.c.bf16 %v939_v2, %v938_v1  ;;  %v954_v3 = vrot.slane %v938_v1, 1  ;;  %v955_v4 = vrot.slane %v939_v2, 1  ;;  %v956_v14 = vrot.slane %v940_v63, 1 }
 0x31e   :  { %v948_v27 = vsel %vm2715_vm9, %v942_v17, %v943_v20  ;;  %v949_v37 = vsel %vm2716_vm5, %v945_v9, %v942_v17  ;;  %v970_v35 = vpack.c.bf16 %v941_v0, %v940_v63  ;;  %v944_v41 = vrot.slane %v940_v63, 7 }
 0x31f   :  { %1196 = vmatprep.mubr.bf16.mxu1 %v967_v21  ;;  %v1600_v22 = vpack.c.bf16 %v948_v27, %v949_v37  ;;  %v959_v23 = vsel %vm2717_vm2, %v955_v4, %v956_v14  ;;  %v960_v26 = vsel %vm2718_vm13, %v954_v3, %v955_v4  ;;  %v958_v28 = vsel %vm2719_vm1, %v956_v14, %v957_v16  ;;  %vm2721_vm1 = vmpackc.low %vm2282_vm12, %vm2277_vm11 }
 0x320   :  { %v1606_v29 = vpack.c.bf16 %v959_v23, %v960_v26  ;;  %v961_v38 = vsel %vm2720_vm3, %v957_v16, %v954_v3  ;;  %vm2722_vm13 = vmmov %vm2716_vm5  ;;  %vm2728_vm12 = vnez %v2695_v25  ;;  %vm2732_vm2 = vnez %v2697_v30 }
 0x321   :  { %1601 = vmatmul.mubr.msk.bf16.vlgmr.msra.gmra.mrb[8].mxu1 %vm2217_vm6, %v1600_v22  ;;  %v1609_v42 = vpack.c.bf16 %v961_v38, %v958_v28  ;;  %v946_v45 = vsel %vm2722_vm13, %v944_v41, %v945_v9  ;;  %vm2723_vm6 = vmmov %vm2716_vm5  ;;  %vm2735_vm5 = vnez %v2701_v39  ;;  %vm2738_vm13 = vnez %v2705_v47 }
 0x322   :  { %1820 = vmatprep.mubr.msk.bf16.mxu0 %vm2232_vm7, %v1606_v29  ;;  %1204 = vmatprep.mubr.bf16.mxu1 %v970_v35  ;;  %v947_v44 = vsel %vm2723_vm6, %v943_v20, %v944_v41  ;;  %vm2724_vm7 = vmmov 0   ;;  %v1627_v35 = vld [vmem:[%s2638_s5] ss:$0 sm:$0xff]  ;;  %s2085_s5 = smov [#allocation8]  }
 0x323   :  { %1821 = vmatmul.mubr.msk.bf16.vlgmr.msra.gmra.mrb[12].mxu0 %vm2243_vm8, %v1609_v42  ;;  %1890 = vmatpush3.bf16.msk.msra.mxu1 %vm2721_vm1, %v2081_v8  ;;  %v1603_v51 = vpack.c.bf16 %v946_v45, %v947_v44  ;;  %vm2725_vm8 = vmpackc.low %vm2306_vm15, %vm2301_vm14  ;;  %vm2729_vm14 = vnez %v2693_v24  ;;  %vm2737_vm1 = vnez %v2707_v48  ;;  %v1371_v45 = vld [vmem:[%s2639_s6] sm:$0x1]  ;;  %s1490_s6 = sshll.u32 %s2085_s5, 4  ;;  %s1491_s6 = int_to_ptr.vmem [resolvable:$true] %s1490_s6 }
 0x324   :  { %1891 = vmatprep.subr.bf16.mxu1 %v2080_v7  ;;  %1860 = vmatpush3.msk.msra.mxu0 %vm2486_vm0, %v2084_v15  ;;  %vm2726_vm0 = vnez %v2689_v18  ;;  %vm2730_vm15 = vmpackc.low %vm2728_vm12, %vm2729_vm14  ;;  %vm2745_vm14 = vcmask 64512   ;;  %s2044_s21 = scalar_lea.vmem %s1491_s6, 512  ;;  %p2049_p11 = scmp.lt.s32.totalorder %s1491_s6, %s1491_s6 }
 0x325   :  { %1861 = vmatprep.mubr.msk.f32.mxu0 %vm2724_vm7, %v2083_v55  ;;  %vm2727_vm11 = vmpackc.low %vm2329_vm4, %vm2726_vm0  ;;  %vm2734_vm4 = vnez %v2703_v40  ;;  %p2045_p10 = scmp.ne.s32.totalorder %s1491_s6, %s2044_s21  ;;  %p2050_p12 = scmp.lt.s32.totalorder %s2044_s21, %s2044_s21 }
 0x326   :  { %vm2736_vm9 = vmpackc.low %vm2734_vm4, %vm2735_vm5 }
 0x327   :  { %1893 = vmatpush3.bf16.msk.msra.mxu1 %vm2725_vm8, %v2081_v8  ;;  %vm2739_vm6 = vmpackc.low %vm2737_vm1, %vm2738_vm13  ;;  %vm2741_vm8 = vnez %v2709_v56  ;;  %p2051_p13 = por %p2050_p12, %p2049_p11 }
 0x328   :  { %1894 = vmatprep.subr.bf16.mxu1 %v2080_v7 }
 0x329   :  { %1604 = vmatmul.mubr.msk.bf16.gmra.mrb[12].mxu1 %vm2257_vm10, %v1603_v51  ;;  %vm2731_vm10 = vnez %v2699_v31  ;;  %p2052_p0 = pnand %p2051_p13, %p2045_p10 }
 0x32a   :  { %1856 = vmatprep.mubr.msk.f32.mxu1 %vm2724_vm7, %v2083_v55  ;;  %vm2733_vm3 = vmpackc.low %vm2731_vm10, %vm2732_vm2  ;;  %vm2740_vm7 = vnez %v2711_v57 }
 0x32b   :  { %1896 = vmatpush3.bf16.msk.msra.mxu1 %vm2727_vm11, %v2081_v8  ;;  %vm2742_vm0 = vmpackc.low %vm2740_vm7, %vm2741_vm8  ;;  %vm2743_vm11 = vcmask 1040384  }
 0x32c   :  { %1897 = vmatprep.subr.bf16.mxu1 %v2080_v7  ;;  %vm2744_vm12 = vmmov %vm2743_vm11 }
 0x32f   :  { %1899 = vmatpush3.bf16.msk.msra.mxu1 %vm2730_vm15, %v2081_v8 }
 0x330   :  { %1900 = vmatprep.subr.bf16.mxu1 %v2080_v7 }
 0x333   :  { %1902 = vmatpush3.bf16.msk.msra.mxu1 %vm2733_vm3, %v2081_v8 }
 0x334   :  { %1903 = vmatprep.subr.bf16.mxu1 %v2080_v7 }
 0x337   :  { %1905 = vmatpush3.bf16.msk.msra.mxu1 %vm2736_vm9, %v2081_v8 }
 0x338   :  { %1906 = vmatprep.subr.bf16.mxu1 %v2080_v7 }
 0x33b   :  { %1908 = vmatpush3.bf16.msk.msra.mxu1 %vm2739_vm6, %v2081_v8 }
 0x33c   :  { %1909 = vmatprep.subr.bf16.mxu1 %v2080_v7 }
 0x33f   :  { %1911 = vmatpush3.bf16.msk.msra.mxu1 %vm2742_vm0, %v2081_v8 }
 0x3f4   :  { %v1703_v54 = vpop.f32.mrb[8].mxu1 }
 0x3f5   :  { %v1704_v61 = vpop.f32.mrb[9].mxu1 }
 0x3f6   :  { %v1705_v5 = vadd.f32 %v1704_v61, %v1703_v54  ;;  %v1822_v6 = vpop.f32.mrb[12].mxu0  ;;  %v1706_v11 = vpop.f32.mrb[10].mxu1 }
 0x3f7   :  { %v1247_v12 = vpop.f32.mrb[13].mxu0  ;;  %v1707_v18 = vpop.f32.mrb[11].mxu1 }
 0x3f8   :  { %v1248_v19 = vadd.f32 %v1705_v5, %v1247_v12  ;;  %v1708_v24 = vadd.f32 %v1707_v18, %v1706_v11  ;;  %v1823_v25 = vpop.f32.mrb[14].mxu0 }
 0x3f9   :  { %v1250_v30 = vpop.f32.mrb[15].mxu0 }
 0x3fa   :  { %v1251_v31 = vadd.f32 %v1708_v24, %v1250_v30  ;;  %v1271_v56 = vmul.f32 %v1248_v19, %v1248_v19 }
 0x3fc   :  { %v1709_v7 = vpop.f32.mrb[12].mxu1  ;;  %v1272_v40 = vmul.f32 %v1251_v31, %v1251_v31  ;;  %v1262_v8 = vadd.f32 %v1251_v31, %v1248_v19 }
 0x3fd   :  { %v1710_v39 = vpop.f32.mrb[13].mxu1 }
 0x3fe   :  { %v1711_v47 = vadd.f32 %v1710_v39, %v1709_v7  ;;  %v1712_v48 = vpop.f32.mrb[14].mxu1  ;;  %v1275_v15 = vadd.f32 %v1272_v40, %v1271_v56 }
 0x3ff   :  { %v1713_v55 = vpop.f32.mrb[15].mxu1 }
 0x400   :  { %v1256_v57 = vadd.f32 %v1822_v6, %v1711_v47  ;;  %v1714_v10 = vadd.f32 %v1713_v55, %v1712_v48 }
 0x402   :  { %v1263_v46 = vadd.f32 %v1262_v8, %v1256_v57  ;;  %v1273_v49 = vmul.f32 %v1256_v57, %v1256_v57  ;;  %v1259_v50 = vadd.f32 %v1823_v25, %v1714_v10 }
 0x404   :  { %v1276_v53 = vadd.f32 %v1275_v15, %v1273_v49  ;;  %v1264_v58 = vadd.f32 %v1263_v46, %v1259_v50  ;;  %v1274_v59 = vmul.f32 %v1259_v50, %v1259_v50 }
 0x406   :  { %v1265_v60 = vrot.slane %v1264_v58, 4  ;;  %v1277_v62 = vadd.f32 %v1276_v53, %v1274_v59 }
 0x408   :  { %v1266_v63 = vadd.f32 %v1265_v60, %v1264_v58  ;;  %v1278_v0 = vrot.slane %v1277_v62, 4 }
 0x40a   :  { %v1267_v1 = vrot.slane %v1266_v63, 2  ;;  %v1279_v2 = vadd.f32 %v1278_v0, %v1277_v62 }
 0x40c   :  { %v1268_v9 = vadd.f32 %v1267_v1, %v1266_v63  ;;  %v1280_v16 = vrot.slane %v1279_v2, 2 }
 0x40e   :  { %v1269_v17 = vrot.slane %v1268_v9, 1  ;;  %v1281_v20 = vadd.f32 %v1280_v16, %v1279_v2 }
 0x410   :  { %v1282_v21 = vrot.slane %v1281_v20, 1  ;;  %v1270_v3 = vadd.f32 %v1269_v17, %v1268_v9 }
 0x412   :  { %v1283_v4 = vadd.f32 %v1282_v21, %v1281_v20 }
 0x414   :  { %v1284_v14 = vsel %vm2743_vm11, %v1270_v3, %v1283_v4 }
 0x415   :  { %1857 = vmatmul.mubr.f32.vlgmr.msra.gmra.mrb[6].mxu1 %v1284_v14 }
 0x4e8   :  { %v1351_v27 = vpop.f32.mrb[6].mxu1 }
 0x4e9   :  { %v1355_v37 = vmul.f32 0.001953125, %v1351_v27  ;;  %v1858_v22 = vpop.f32.mrb[7].mxu1 }
 0x4eb   :  { %v1356_v23 = vmul.f32 %v1355_v37, %v1355_v37 }
 0x4ed   :  { %v1358_v26 = vrot.slane %v1356_v23, 7 }
 0x4ef   :  { %v1360_v28 = vsub.f32 %v1355_v37, %v1358_v26 }
 0x4f1   :  { %v1361_v29 = vadd.f32 1e-05, %v1360_v28 }
 0x4f3   :  { %1976 = vrsqrt.f32 %v1361_v29 }
 0x4fd   :  { %v1977_v38 = vpop.eup %1976 }
 0x4fe   :  { %v1370_v41 = vmul.f32 %v1977_v38, %v1627_v35 }
 0x500   :  { %v1373_v42 = vrot.slane %v1370_v41, 1 }
 0x502   :  { %v1375_v44 = vmul.f32 %v1373_v42, %v1355_v37 }
 0x504   :  { %v1376_v51 = vsub.f32 %v1371_v45, %v1375_v44 }
 0x506   :  { %v1381_v54 = vrot.slane %v1376_v51, %v2500_v52 }
 0x508   :  { %v1383_v61 = vsel %vm2744_vm12, %v1373_v42, %v1381_v54 }
 0x509   :  { %1862 = vmatmul.mubr.msk.f32.vlgmr.msra.gmra.mrb[10].mxu0 %vm2745_vm14, %v1383_v61 }
 0x5dc   :  { %v1453_v5 = vpop.f32.mrb[10].mxu0 }
 0x5dd   :  { %v1460_v6 = vrot.slane %v1453_v5, %v2500_v52  ;;  %v1863_v11 = vpop.f32.mrb[11].mxu0  ;;  %v1468_v12 = vrot.slane %v1453_v5, %v932_v36 }
 0x5df   :  { %v1461_v18 = vmul.f32 %v1460_v6, %v1248_v19  ;;  %v1462_v24 = vmul.f32 %v1460_v6, %v1251_v31  ;;  %v1463_v25 = vmul.f32 %v1460_v6, %v1256_v57  ;;  %v1464_v30 = vmul.f32 %v1460_v6, %v1259_v50 }
 0x5e1   :  { %v1469_v7 = vadd.f32 %v1468_v12, %v1461_v18  ;;  %v1470_v39 = vadd.f32 %v1468_v12, %v1462_v24  ;;  %v1471_v40 = vadd.f32 %v1468_v12, %v1463_v25  ;;  %v1472_v47 = vadd.f32 %v1468_v12, %v1464_v30 }
 0x5e3   :  { %v1473_v48 = vadd.f32 %v1469_v7, %v2192_v32  ;;  %v1474_v55 = vadd.f32 %v1470_v39, %v2194_v33  ;;  %v1475_v52 = vadd.f32 %v1471_v40, %v2212_v43  ;;  %v1476_v56 = vadd.f32 %v1472_v47, %v2196_v34 }
 0x5e5   :  { %v1477_v13 = vmax.f32 %v1473_v48, 0.0  ;;  %v1478_v36 = vmax.f32 %v1474_v55, 0.0  ;;  %v1479_v19 = vmax.f32 %v1475_v52, 0.0  ;;  %v1480_v31 = vmax.f32 %v1476_v56, 0.0 }
 0x5e7   :  { %1481 = vst [vmem:[#allocation8] sm:$0xff] %v1477_v13  ;;  %1482 = vst [vmem:[#allocation8 + $0x8] sm:$0xff] %v1478_v36 }
 0x5e8   :  { %1483 = vst [vmem:[#allocation8 + $0x10] sm:$0xff] %v1479_v19  ;;  %1484 = vst [vmem:[#allocation8 + $0x18] sm:$0xff] %v1480_v31 }
 0x5e9   :  { %2055 = shalt.err (!%p2052_p0)
}
 0x5ea   :  { %s2056_s24 = scalar_lea.hbm %s2640_s7, 512 }
 0x5eb   :  { %p2057_p1 = scmp.ne.s32.totalorder %s2640_s7, %s2056_s24  ;;  %p2060_p2 = scmp.lt.u32.totalorder %s2056_s24, %s2640_s7 }
 0x5ed   :  { %p2062_p3 = pnand %p2060_p2, %p2057_p1 }
 0x5ef   :  { %2065 = shalt.err (!%p2062_p3)
}
 0x5f0   :  { %1496 = dma.vmem_to_hbm [thread:$0]  %s1491_s6, 512, %s2640_s7, [#allocation4], %s2076_s1, %s2076_s1, %s2077_s25  }
 0x5f1   :  { %2070 = dma.done.wait [#allocation4], 512  }
 0x5f2   :  { %2071 = vsyncadd [#allocation4], 4294966784 }
 0x5f3   :  { %1500 = vsyncpa [#allocation3], 1 }
 0x5f4   :  { %1501 = vsyncpa [#allocation6], 1 }
 0x5f5   :  { %1502 = vsyncpa [#allocation4], 1 }

</bundles_post_ra>
